<compile_context>
chip_gen: v6e
topology: v6e:2x2x1
jax: 0.10.0
libtpu: 0.0.40
codegen_flags: <defaults>
</compile_context>

<pallas_src>
import jax
import jax.numpy as jnp
from jax.experimental import pallas as pl
from jax.experimental.pallas import tpu as pltpu


NEG_SLOPE = 0.01  # nn.LeakyReLU default


def _round_up(x, m):
    return ((x + m - 1) // m) * m


# ----------------------------------------------------------------------------
# One-time, cached hardware / capability queries
# ----------------------------------------------------------------------------
_TPU_INFO_CACHE = None
_BUFFERED1_OK = None


def _tpu_generation_info():
    """Returns (vmem_capacity_bytes, multi_tensorcore, mxu_m)."""
    global _TPU_INFO_CACHE
    if _TPU_INFO_CACHE is not None:
        return _TPU_INFO_CACHE

    vmem_cap = 64 << 20      # conservative default (v7x per-TC VMEM)
    multi_tc = False         # v5e/v6e: 1 TC per chip
    mxu_m = 256              # v6e/v7x MXU M dimension
    try:
        cap = getattr(pltpu.get_tpu_info(), "vmem_capacity_bytes", None)
        if cap:
            vmem_cap = int(cap)
    except Exception:
        pass
    try:
        kind = jax.devices()[0].device_kind.lower()
        multi_tc = ("v7" in kind) or ("7x" in kind)
        if any(g in kind for g in ("v2", "v3", "v4", "v5")):
            mxu_m = 128      # 128-wide MXU M on older generations
    except Exception:
        pass

    _TPU_INFO_CACHE = (vmem_cap, multi_tc, mxu_m)
    return _TPU_INFO_CACHE


def _buffered1_supported():
    """One-time probe: does this build accept Buffered(1) on grid-invariant inputs?"""
    global _BUFFERED1_OK
    if _BUFFERED1_OK is not None:
        return _BUFFERED1_OK

    def _probe_kernel(x_ref, w_ref, o_ref):
        o_ref[...] = x_ref[...] + w_ref[...]

    try:
        fn = pl.pallas_call(
            _probe_kernel,
            out_shape=jax.ShapeDtypeStruct((16, 128), jnp.float32),
            grid_spec=pltpu.PrefetchScalarGridSpec(
                num_scalar_prefetch=0,
                grid=(2,),
                in_specs=[
                    pl.BlockSpec((8, 128), lambda i: (i, 0)),
                    pl.BlockSpec((8, 128), lambda i: (0, 0),
                                 pipeline_mode=pl.Buffered(buffer_count=1)),
                ],
                out_specs=pl.BlockSpec((8, 128), lambda i: (i, 0)),
            ),
        )
        jax.jit(fn).lower(
            jax.ShapeDtypeStruct((16, 128), jnp.float32),
            jax.ShapeDtypeStruct((8, 128), jnp.float32),
        ).compile()
        _BUFFERED1_OK = True
    except Exception:
        _BUFFERED1_OK = False
    return _BUFFERED1_OK


# ----------------------------------------------------------------------------
# Kernel
# ----------------------------------------------------------------------------
def _make_mlp_kernel(nlayers: int):
    """Fused kernel: `nlayers` hidden (Linear+LeakyReLU) layers + final Linear."""

    def kernel(x_ref, *refs):
        # refs = (w0, b0, w1, b1, ..., w_final, b_final, out_ref)
        out_ref = refs[-1]
        params = refs[:-1]

        h = x_ref[...]
        for i in range(nlayers + 1):
            w = params[2 * i][...]
            b = params[2 * i + 1][...]
            if h.dtype != w.dtype:
                h = h.astype(w.dtype)            # bf16-native MXU path
            h = jnp.dot(h, w, preferred_element_type=jnp.float32)
            h = h + b                            # bias kept f32 on host: exact add, no cast
            if i < nlayers:
                h = jnp.maximum(h, NEG_SLOPE * h)  # LeakyReLU: single vmax in f32
        out_ref[...] = h.astype(out_ref.dtype)

    return kernel


# ----------------------------------------------------------------------------
# Wrapper
# ----------------------------------------------------------------------------
def regression_model_forward(x, params, *, block_b=None, param_dtype=jnp.bfloat16):
    """MLP forward in a single fused Pallas kernel.

    x:      [B, nfeatures] (f32)
    params: list of (W, b) tuples, W: [in, out], b: [1, out] (f32; W cast to
            `param_dtype` internally).
    """
    B, F = x.shape
    nlayers = len(params) - 1
    ntargets = params[-1][0].shape[1]

    vmem_cap, multi_tc, mxu_m = _tpu_generation_info()
    buffered1 = _buffered1_supported()

    # ---- pad every layer's out dim (and next layer's in dim) to a multiple of 128,
    #      cast weights to bf16 once on the host; biases stay f32 (exact). ----
    padded = []
    for li, (w, b) in enumerate(params):
        din, dout = w.shape
        din_pad = din if li == 0 else _round_up(din, 128)   # first layer keeps raw F
        dout_pad = _round_up(dout, 128)
        w = jnp.pad(w, ((0, din_pad - din), (0, dout_pad - dout))).astype(param_dtype)
        b = jnp.pad(b, ((0, 0), (0, dout_pad - dout))).astype(jnp.float32)
        padded.append((w, b))
    params = padded
    n_pad = params[-1][0].shape[1]
    h_max = max(w.shape[1] for (w, _) in params)

    weight_bytes = sum(w.size * w.dtype.itemsize + b.size * b.dtype.itemsize
                       for (w, b) in params)
    weight_resident = weight_bytes * (1 if buffered1 else 2)
    # TODO(synk): beyond ~0.6*vmem_cap of resident weights, add K/N "arbitrary" grid
    # axes with a VMEM f32 accumulator instead of the fully-resident-weights path.

    # ---- generation-aware batch tile ----
    if block_b is None:
        act_budget = max(2 << 20, int(0.7 * vmem_cap) - weight_resident)
        row_bytes = (x.dtype.itemsize * F          # x tile row
                     + 4 * h_max                   # widest f32 activation row
                     + x.dtype.itemsize * n_pad)   # output tile row
        max_rows = max(8, (act_budget // (4 * row_bytes)) // 8 * 8)
        block_b = min(2048, _round_up(B, 8), int(max_rows))
        if multi_tc:
            # v7x: allow 2 parallel grid steps, but never drop below an MXU-M tile.
            half = _round_up((B + 1) // 2, 8)
            if half >= mxu_m:
                block_b = min(block_b, half)
        block_b = max(8, block_b)
    assert block_b % 8 == 0, "block_b must be a multiple of 8 for TPU sublane tiling"

    B_pad = _round_up(B, block_b)
    if B_pad != B:
        x = jnp.pad(x, ((0, B_pad - B), (0, 0)))   # no silently dropped rows
    grid = (B_pad // block_b,)

    # ---- VMEM scoped-limit hint, capped at ~80% of this generation's capacity ----
    io_bytes = 2 * block_b * F * x.dtype.itemsize + 2 * block_b * n_pad * x.dtype.itemsize
    act_bytes = 4 * block_b * max(F, h_max, n_pad) * 4
    vmem_limit = int(min(int(0.8 * vmem_cap),
                         max(32 << 20, weight_resident + io_bytes + act_bytes)))

    kernel = _make_mlp_kernel(nlayers)

    def _const_spec(shape):
        # Grid-invariant block: a single buffer halves the weight VMEM footprint.
        if buffered1:
            return pl.BlockSpec(shape, lambda i: (0, 0),
                                pipeline_mode=pl.Buffered(buffer_count=1))
        return pl.BlockSpec(shape, lambda i: (0, 0))

    in_specs = [pl.BlockSpec((block_b, F), lambda i: (i, 0))]
    flat_params = []
    for (w, b) in params:
        in_specs.append(_const_spec(w.shape))
        in_specs.append(_const_spec(b.shape))
        flat_params.extend([w, b])
    out_specs = pl.BlockSpec((block_b, n_pad), lambda i: (i, 0))

    fn = pl.pallas_call(
        kernel,
        out_shape=jax.ShapeDtypeStruct((B_pad, n_pad), x.dtype),
        grid_spec=pltpu.PrefetchScalarGridSpec(
            num_scalar_prefetch=0,
            grid=grid,
            in_specs=in_specs,
            out_specs=out_specs,
        ),
        compiler_params=pltpu.CompilerParams(
            dimension_semantics=("parallel",),
            vmem_limit_bytes=vmem_limit,
        ),
    )
    out = fn(x, *flat_params)
    return out[:B, :ntargets]


# ----------------------------------------------------------------------------
# Params + reference
# ----------------------------------------------------------------------------
def init_params(key, nfeatures, ntargets, nlayers, hidden_size):
    """Deterministic init mimicking PyTorch Linear: U(-1/sqrt(fan_in), 1/sqrt(fan_in))."""
    dims = []
    in_dim = nfeatures
    for _ in range(nlayers):
        dims.append((in_dim, hidden_size))
        in_dim = hidden_size
    dims.append((in_dim, ntargets))

    params = []
    for (din, dout) in dims:
        key, kw, kb = jax.random.split(key, 3)
        bound = 1.0 / jnp.sqrt(jnp.float32(din))
        w = jax.random.uniform(kw, (din, dout), jnp.float32, -bound, bound)
        b = jax.random.uniform(kb, (1, dout), jnp.float32, -bound, bound)
        params.append((w, b))
    return params


def reference_forward(x, params, param_dtype=jnp.bfloat16):
    """Pure-JAX reference mirroring the kernel's numerics (bf16 W, f32 accumulate)."""
    h = x
    nlayers = len(params) - 1
    for i in range(nlayers):
        w, b = params[i]
        h = jnp.dot(h.astype(param_dtype), w.astype(param_dtype),
                    preferred_element_type=jnp.float32) + b.astype(jnp.float32)
        h = jnp.maximum(h, NEG_SLOPE * h)
    w, b = params[-1]
    return jnp.dot(h.astype(param_dtype), w.astype(param_dtype),
                   preferred_element_type=jnp.float32) + b.astype(jnp.float32)


if __name__ == "__main__":
    # Small shapes consistent with the module's forward: x is [batch, nfeatures].
    # batch=10 deliberately not a multiple of the tile to exercise pad+slice path.
    batch = 10
    nfeatures = 32
    ntargets = 4
    nlayers = 2
    hidden_size = 64

    key = jax.random.PRNGKey(0)
    key, kx = jax.random.split(key)
    x = jax.random.normal(kx, (batch, nfeatures), jnp.float32)

    params = init_params(key, nfeatures, ntargets, nlayers, hidden_size)

    out = regression_model_forward(x, params)
    out = jax.block_until_ready(out)

    ref = reference_forward(x, params)
    assert out.shape == (batch, ntargets), f"bad shape {out.shape}"
    assert jnp.allclose(out, ref, atol=1e-3, rtol=1e-3), "mismatch vs reference"

    print("KERNEL_OK")
</pallas_src>

<mosaic_0001>
module attributes {stable_mosaic.version = 11 : i64} {
  func.func @kernel(%arg0: i32, %arg1: memref<16x32xf32, #tpu.memory_space<vmem>>, %arg2: memref<32x128xbf16, #tpu.memory_space<vmem>>, %arg3: memref<1x128xf32, #tpu.memory_space<vmem>>, %arg4: memref<128x128xbf16, #tpu.memory_space<vmem>>, %arg5: memref<1x128xf32, #tpu.memory_space<vmem>>, %arg6: memref<128x128xbf16, #tpu.memory_space<vmem>>, %arg7: memref<1x128xf32, #tpu.memory_space<vmem>>, %arg8: memref<16x128xf32, #tpu.memory_space<vmem>>) attributes {dimension_semantics = [#tpu.dimension_semantics<parallel>], iteration_bounds = array<i64: 1>, scalar_prefetch = 0 : i64, scratch_operands = 0 : i64, tpu.core_type = #tpu.core_type<tc>, window_params = [{transform_indices = @transform_0, window_bounds = array<i64: 16, 32>}, {pipeline_mode = #tpu.pipeline_mode<synchronous>, transform_indices = @transform_1, window_bounds = array<i64: 32, 128>}, {pipeline_mode = #tpu.pipeline_mode<synchronous>, transform_indices = @transform_2, window_bounds = array<i64: 1, 128>}, {pipeline_mode = #tpu.pipeline_mode<synchronous>, transform_indices = @transform_3, window_bounds = array<i64: 128, 128>}, {pipeline_mode = #tpu.pipeline_mode<synchronous>, transform_indices = @transform_4, window_bounds = array<i64: 1, 128>}, {pipeline_mode = #tpu.pipeline_mode<synchronous>, transform_indices = @transform_5, window_bounds = array<i64: 128, 128>}, {pipeline_mode = #tpu.pipeline_mode<synchronous>, transform_indices = @transform_6, window_bounds = array<i64: 1, 128>}, {transform_indices = @transform_7, window_bounds = array<i64: 16, 128>}]} {
    %c0 = arith.constant 0 : index
    %c0_0 = arith.constant 0 : index
    %0 = vector.load %arg1[%c0, %c0_0] : memref<16x32xf32, #tpu.memory_space<vmem>>, vector<16x32xf32>
    %c0_1 = arith.constant 0 : index
    %c0_2 = arith.constant 0 : index
    %1 = vector.load %arg2[%c0_1, %c0_2] : memref<32x128xbf16, #tpu.memory_space<vmem>>, vector<32x128xbf16>
    %c0_3 = arith.constant 0 : index
    %c0_4 = arith.constant 0 : index
    %2 = vector.load %arg3[%c0_3, %c0_4] : memref<1x128xf32, #tpu.memory_space<vmem>>, vector<1x128xf32>
    %3 = arith.truncf %0 : vector<16x32xf32> to vector<16x32xbf16>
    %cst = arith.constant dense<0.000000e+00> : vector<16x128xf32>
    %4 = tpu.matmul %3, %1, %cst {dimension_numbers = #tpu.dot_dimension_numbers<[1], [0], [0], [1], [0, 0, 1, 1], [], []>} : vector<16x32xbf16>, vector<32x128xbf16>, vector<16x128xf32> -> vector<16x128xf32>
    %5 = vector.broadcast %2 : vector<1x128xf32> to vector<16x128xf32>
    %6 = arith.addf %4, %5 : vector<16x128xf32>
    %cst_5 = arith.constant 0.00999999977 : f32
    %7 = vector.broadcast %cst_5 : f32 to vector<16x128xf32>
    %8 = arith.mulf %7, %6 : vector<16x128xf32>
    %9 = arith.maximumf %6, %8 : vector<16x128xf32>
    %c0_6 = arith.constant 0 : index
    %c0_7 = arith.constant 0 : index
    %10 = vector.load %arg4[%c0_6, %c0_7] : memref<128x128xbf16, #tpu.memory_space<vmem>>, vector<128x128xbf16>
    %c0_8 = arith.constant 0 : index
    %c0_9 = arith.constant 0 : index
    %11 = vector.load %arg5[%c0_8, %c0_9] : memref<1x128xf32, #tpu.memory_space<vmem>>, vector<1x128xf32>
    %12 = arith.truncf %9 : vector<16x128xf32> to vector<16x128xbf16>
    %cst_10 = arith.constant dense<0.000000e+00> : vector<16x128xf32>
    %13 = tpu.matmul %12, %10, %cst_10 {dimension_numbers = #tpu.dot_dimension_numbers<[1], [0], [0], [1], [0, 0, 1, 1], [], []>} : vector<16x128xbf16>, vector<128x128xbf16>, vector<16x128xf32> -> vector<16x128xf32>
    %14 = vector.broadcast %11 : vector<1x128xf32> to vector<16x128xf32>
    %15 = arith.addf %13, %14 : vector<16x128xf32>
    %cst_11 = arith.constant 0.00999999977 : f32
    %16 = vector.broadcast %cst_11 : f32 to vector<16x128xf32>
    %17 = arith.mulf %16, %15 : vector<16x128xf32>
    %18 = arith.maximumf %15, %17 : vector<16x128xf32>
    %c0_12 = arith.constant 0 : index
    %c0_13 = arith.constant 0 : index
    %19 = vector.load %arg6[%c0_12, %c0_13] : memref<128x128xbf16, #tpu.memory_space<vmem>>, vector<128x128xbf16>
    %c0_14 = arith.constant 0 : index
    %c0_15 = arith.constant 0 : index
    %20 = vector.load %arg7[%c0_14, %c0_15] : memref<1x128xf32, #tpu.memory_space<vmem>>, vector<1x128xf32>
    %21 = arith.truncf %18 : vector<16x128xf32> to vector<16x128xbf16>
    %cst_16 = arith.constant dense<0.000000e+00> : vector<16x128xf32>
    %22 = tpu.matmul %21, %19, %cst_16 {dimension_numbers = #tpu.dot_dimension_numbers<[1], [0], [0], [1], [0, 0, 1, 1], [], []>} : vector<16x128xbf16>, vector<128x128xbf16>, vector<16x128xf32> -> vector<16x128xf32>
    %23 = vector.broadcast %20 : vector<1x128xf32> to vector<16x128xf32>
    %24 = arith.addf %22, %23 : vector<16x128xf32>
    %c0_17 = arith.constant 0 : index
    %c0_18 = arith.constant 0 : index
    %25 = vector.load %arg8[%c0_17, %c0_18] : memref<16x128xf32, #tpu.memory_space<vmem>>, vector<16x128xf32>
    tpu.vector_store %arg8[%c0_17, %c0_18], %24 {strides = array<i32>} : memref<16x128xf32, #tpu.memory_space<vmem>>, vector<16x128xf32>,
    return
  }
  func.func @transform_0(%arg0: i32) -> (i32, i32) {
    %c0_i32 = arith.constant 0 : i32
    %c0_i32_0 = arith.constant 0 : i32
    return %arg0, %c0_i32 : i32, i32
  }
  func.func @transform_1(%arg0: i32) -> (i32, i32) {
    %c0_i32 = arith.constant 0 : i32
    %c0_i32_0 = arith.constant 0 : i32
    %c0_i32_1 = arith.constant 0 : i32
    return %c0_i32, %c0_i32_0 : i32, i32
  }
  func.func @transform_2(%arg0: i32) -> (i32, i32) {
    %c0_i32 = arith.constant 0 : i32
    %c0_i32_0 = arith.constant 0 : i32
    %c0_i32_1 = arith.constant 0 : i32
    return %c0_i32, %c0_i32_0 : i32, i32
  }
  func.func @transform_3(%arg0: i32) -> (i32, i32) {
    %c0_i32 = arith.constant 0 : i32
    %c0_i32_0 = arith.constant 0 : i32
    %c0_i32_1 = arith.constant 0 : i32
    return %c0_i32, %c0_i32_0 : i32, i32
  }
  func.func @transform_4(%arg0: i32) -> (i32, i32) {
    %c0_i32 = arith.constant 0 : i32
    %c0_i32_0 = arith.constant 0 : i32
    %c0_i32_1 = arith.constant 0 : i32
    return %c0_i32, %c0_i32_0 : i32, i32
  }
  func.func @transform_5(%arg0: i32) -> (i32, i32) {
    %c0_i32 = arith.constant 0 : i32
    %c0_i32_0 = arith.constant 0 : i32
    %c0_i32_1 = arith.constant 0 : i32
    return %c0_i32, %c0_i32_0 : i32, i32
  }
  func.func @transform_6(%arg0: i32) -> (i32, i32) {
    %c0_i32 = arith.constant 0 : i32
    %c0_i32_0 = arith.constant 0 : i32
    %c0_i32_1 = arith.constant 0 : i32
    return %c0_i32, %c0_i32_0 : i32, i32
  }
  func.func @transform_7(%arg0: i32) -> (i32, i32) {
    %c0_i32 = arith.constant 0 : i32
    %c0_i32_0 = arith.constant 0 : i32
    return %arg0, %c0_i32 : i32, i32
  }
}

</mosaic_0001>

<bundles_post_ra>
// kernel: tpu_custom_call.1
= control target key start
LH: loop header
LB: loop body
LE: loop exit
PB: predicated region body
PF: predicated region fallthrough
CT: control target
= control target key end

     0   :  { %12 = vsyncpa [#allocation3], 0  ;;  %s751_s0 = inlined_call_operand.hbm [shape: f32[16,32], index: 0, kind: input, shape index: {}]   ;;  %s752_s1 = inlined_call_operand.hbm [shape: bf16[32,128], index: 1, kind: input, shape index: {}]   ;;  %s753_s2 = inlined_call_operand.vmem [shape: f32[1,128], index: 2, kind: input, shape index: {}]   ;;  %s754_s3 = inlined_call_operand.hbm [shape: bf16[128,128], index: 3, kind: input, shape index: {}]   ;;  %s755_s4 = inlined_call_operand.vmem [shape: f32[1,128], index: 4, kind: input, shape index: {}]   ;;  %s756_s5 = inlined_call_operand.hbm [shape: bf16[128,128], index: 5, kind: input, shape index: {}]   ;;  %s757_s6 = inlined_call_operand.vmem [shape: f32[1,128], index: 6, kind: input, shape index: {}]   ;;  %s758_s7 = inlined_call_operand.hbm [shape: f32[16,128], index: 7, kind: output, shape index: {}]  }
   0x1   :  { %13 = vsyncpa [#allocation6], 0 }
   0x2   :  { %14 = vsyncpa [#allocation9], 0 }
   0x3   :  { %15 = vsyncpa [#allocation4], 0  ;;  %s637_s24 = smov [#allocation5]  }
   0x4   :  { %s33_s25 = sshll.u32 %s637_s24, 4  ;;  %s34_s25 = int_to_ptr.vmem [resolvable:$true] %s33_s25 }
   0x5   :  { %s537_s26 = scalar_lea.vmem %s34_s25, 256  ;;  %p542_p1 = scmp.lt.s32.totalorder %s34_s25, %s34_s25 }
   0x6   :  { %p538_p0 = scmp.ne.s32.totalorder %s34_s25, %s537_s26  ;;  %p543_p2 = scmp.lt.s32.totalorder %s537_s26, %s537_s26 }
   0x8   :  { %p544_p3 = por %p543_p2, %p542_p1 }
   0xa   :  { %p545_p4 = pnand %p544_p3, %p538_p0 }
   0xc   :  { %548 = shalt.err (!%p545_p4)
}
   0xd   :  { %s638_s27 = smov 64   ;;  %s639_s28 = smov 4  }
   0xe   :  { %39 = dma.hbm_to_vmem [thread:$0]  %s752_s1, 256, %s34_s25, [#allocation6], %s638_s27, %s638_s27, %s639_s28  }
   0xf   :  { %s640_s8 = smov [#allocation2]  }
  0x10   :  { %s21_s9 = sshll.u32 %s640_s8, 4  ;;  %s22_s9 = int_to_ptr.vmem [resolvable:$true] %s21_s9 }
  0x11   :  { %s557_s10 = scalar_lea.vmem %s22_s9, 256  ;;  %p562_p6 = scmp.lt.s32.totalorder %s22_s9, %s22_s9 }
  0x12   :  { %p558_p5 = scmp.ne.s32.totalorder %s22_s9, %s557_s10  ;;  %p563_p7 = scmp.lt.s32.totalorder %s557_s10, %s557_s10 }
  0x14   :  { %p564_p8 = por %p563_p7, %p562_p6 }
  0x16   :  { %p565_p9 = pnand %p564_p8, %p558_p5 }
  0x18   :  { %568 = shalt.err (!%p565_p9)
}
  0x19   :  { %s641_s11 = smov 128   ;;  %s642_s12 = smov 8  }
  0x1a   :  { %27 = dma.hbm_to_vmem [thread:$0]  %s751_s0, 256, %s22_s9, [#allocation3], %s641_s11, %s641_s11, %s642_s12  }
  0x1b   :  { %s643_s1 = smov [#allocation7]   ;;  %s644_s16 = smov [#allocation8]  }
  0x1c   :  { %s47_s15 = sshll.u32 %s643_s1, 4  ;;  %s61_s17 = sshll.u32 %s644_s16, 4  ;;  %s48_s15 = int_to_ptr.vmem [resolvable:$true] %s47_s15  ;;  %s62_s17 = int_to_ptr.vmem [resolvable:$true] %s61_s17 }
  0x1d   :  { %s577_s18 = scalar_lea.vmem %s48_s15, 1024  ;;  %p582_p11 = scmp.lt.s32.totalorder %s48_s15, %s48_s15 }
  0x1e   :  { %p578_p10 = scmp.ne.s32.totalorder %s48_s15, %s577_s18  ;;  %p583_p12 = scmp.lt.s32.totalorder %s577_s18, %s577_s18 }
  0x20   :  { %p584_p13 = por %p583_p12, %p582_p11 }
  0x22   :  { %p585_p0 = pnand %p584_p13, %p578_p10 }
  0x24   :  { %588 = shalt.err (!%p585_p0)
}
  0x25   :  { %53 = dma.hbm_to_vmem [thread:$0]  %s754_s3, 1024, %s48_s15, [#allocation6], %s638_s27, %s638_s27, %s639_s28  }
  0x26   :  { %s597_s0 = scalar_lea.vmem %s62_s17, 1024  ;;  %p602_p2 = scmp.lt.s32.totalorder %s62_s17, %s62_s17 }
  0x27   :  { %p598_p1 = scmp.ne.s32.totalorder %s62_s17, %s597_s0  ;;  %p603_p3 = scmp.lt.s32.totalorder %s597_s0, %s597_s0 }
  0x29   :  { %p604_p4 = por %p603_p3, %p602_p2 }
  0x2b   :  { %p605_p5 = pnand %p604_p4, %p598_p1 }
  0x2d   :  { %608 = shalt.err (!%p605_p5)
}
  0x2e   :  { %67 = dma.hbm_to_vmem [thread:$0]  %s756_s5, 1024, %s62_s17, [#allocation9], %s638_s27, %s638_s27, %s639_s28  }
  0x2f   :  { %629 = dma.done.wait [#allocation3], 256  }
  0x30   :  { %630 = vsyncadd [#allocation3], 4294967040 }
  0x31   :  { %631 = dma.done.wait [#allocation6], 1280  }
  0x32   :  { %632 = vsyncadd [#allocation6], 4294966016 }
  0x33   :  { %633 = dma.done.wait [#allocation9], 1024  }
  0x34   :  { %634 = vsyncadd [#allocation9], 4294966272  ;;  %v645_v0 = vmov 0.0   ;;  %vm646_vm0 = vmmov 0   ;;  %v511_v1 = vld [vmem:[#allocation5 + $0x8] sm:$0xff]   ;;  %v512_v2 = vld [vmem:[#allocation5] sm:$0xff]  }
  0x35   :  { %452 = vmatprep.subr.bf16.mxu0 %v645_v0  ;;  %456 = vmatprep.mubr.msk.bf16.mxu0 %vm646_vm0, %v645_v0  ;;  %v83_v3 = vld [vmem:[#allocation2] sm:$0xff]  ;;  %v84_v4 = vld [vmem:[#allocation2 + $0x8] sm:$0xff]  ;;  %v513_v5 = vld [vmem:[#allocation7 + $0x38] sm:$0xff]   ;;  %vm109_vm1 = vcmask 261120  }
  0x36   :  { %460 = vmatprep.subr.bf16.mxu1 %v645_v0  ;;  %476 = vmatprep.mubr.msk.bf16.mxu1 %vm646_vm0, %v645_v0  ;;  %v90_v6 = vpack.c.bf16 %v84_v4, %v83_v3  ;;  %v514_v7 = vld [vmem:[#allocation7 + $0x30] sm:$0xff]   ;;  %v515_v8 = vld [vmem:[#allocation7 + $0x28] sm:$0xff]   ;;  %v516_v9 = vld [vmem:[#allocation7 + $0x20] sm:$0xff]  }
  0x37   :  { %453 = vmatpush3.bf16.msra.mxu0 %v511_v1  ;;  %461 = vmatpush3.bf16.msra.mxu1 %v513_v5  ;;  %v517_v10 = vld [vmem:[#allocation7 + $0x18] sm:$0xff]   ;;  %v518_v11 = vld [vmem:[#allocation7 + $0x10] sm:$0xff]   ;;  %v519_v12 = vld [vmem:[#allocation7 + $0x8] sm:$0xff]  }
  0x38   :  { %454 = vmatprep.subr.bf16.mxu0 %v645_v0  ;;  %462 = vmatprep.subr.bf16.mxu1 %v645_v0  ;;  %v520_v13 = vld [vmem:[#allocation7] sm:$0xff]   ;;  %v521_v14 = vld [vmem:[#allocation8 + $0x38] sm:$0xff]   ;;  %v522_v15 = vld [vmem:[#allocation8 + $0x30] sm:$0xff]  }
  0x39   :  { %v523_v16 = vld [vmem:[#allocation8 + $0x28] sm:$0xff]   ;;  %v524_v17 = vld [vmem:[#allocation8 + $0x20] sm:$0xff]   ;;  %v525_v18 = vld [vmem:[#allocation8 + $0x18] sm:$0xff]  }
  0x3a   :  { %v409_v19 = vld [vmem:[%s753_s2] ss:$0 sm:$0xff]  ;;  %v526_v31 = vld [vmem:[#allocation8 + $0x10] sm:$0xff]   ;;  %v527_v32 = vld [vmem:[#allocation8 + $0x8] sm:$0xff]  }
  0x3b   :  { %455 = vmatpush3.bf16.msra.mxu0 %v512_v2  ;;  %463 = vmatpush3.bf16.msra.mxu1 %v514_v7  ;;  %v528_v33 = vld [vmem:[#allocation8] sm:$0xff]  }
  0x3c   :  { %480 = vmatprep.subr.bf16.mxu0 %v645_v0  ;;  %464 = vmatprep.subr.bf16.mxu1 %v645_v0  ;;  %v413_v34 = vld [vmem:[%s755_s4] ss:$0 sm:$0xff]  ;;  %s647_s4 = smov [#allocation10]  }
  0x3d   :  { %v422_v46 = vld [vmem:[%s757_s6] ss:$0 sm:$0xff]  ;;  %s395_s26 = sshll.u32 %s647_s4, 4  ;;  %s396_s26 = int_to_ptr.vmem [resolvable:$true] %s395_s26 }
  0x3e   :  { %457 = vmatmul.mubr.msk.bf16.vlgmr.msra.gmra.mxu0 %vm109_vm1, %v90_v6  ;;  %s609_s27 = scalar_lea.vmem %s396_s26, 256  ;;  %p614_p7 = scmp.lt.s32.totalorder %s396_s26, %s396_s26 }
  0x3f   :  { %496 = vmatprep.mubr.msk.bf16.mxu0 %vm646_vm0, %v645_v0  ;;  %465 = vmatpush3.bf16.msra.mxu1 %v515_v8  ;;  %p610_p6 = scmp.ne.s32.totalorder %s396_s26, %s609_s27  ;;  %p615_p8 = scmp.lt.s32.totalorder %s609_s27, %s609_s27 }
  0x40   :  { %466 = vmatprep.subr.bf16.mxu1 %v645_v0  ;;  %481 = vmatpush3.bf16.msra.mxu0 %v521_v14 }
  0x41   :  { %482 = vmatprep.subr.bf16.mxu0 %v645_v0  ;;  %p616_p9 = por %p615_p8, %p614_p7 }
  0x43   :  { %467 = vmatpush3.bf16.msra.mxu1 %v516_v9  ;;  %p617_p10 = pnand %p616_p9, %p610_p6 }
  0x44   :  { %468 = vmatprep.subr.bf16.mxu1 %v645_v0  ;;  %483 = vmatpush3.bf16.msra.mxu0 %v522_v15 }
  0x45   :  { %484 = vmatprep.subr.bf16.mxu0 %v645_v0 }
  0x47   :  { %469 = vmatpush3.bf16.msra.mxu1 %v517_v10 }
  0x48   :  { %470 = vmatprep.subr.bf16.mxu1 %v645_v0  ;;  %485 = vmatpush3.bf16.msra.mxu0 %v523_v16 }
  0x49   :  { %486 = vmatprep.subr.bf16.mxu0 %v645_v0 }
  0x4b   :  { %471 = vmatpush3.bf16.msra.mxu1 %v518_v11 }
  0x4c   :  { %472 = vmatprep.subr.bf16.mxu1 %v645_v0  ;;  %487 = vmatpush3.bf16.msra.mxu0 %v524_v17 }
  0x4d   :  { %488 = vmatprep.subr.bf16.mxu0 %v645_v0 }
  0x4f   :  { %473 = vmatpush3.bf16.msra.mxu1 %v519_v12 }
  0x50   :  { %474 = vmatprep.subr.bf16.mxu1 %v645_v0  ;;  %489 = vmatpush3.bf16.msra.mxu0 %v525_v18 }
  0x51   :  { %490 = vmatprep.subr.bf16.mxu0 %v645_v0 }
  0x53   :  { %475 = vmatpush3.bf16.msra.mxu1 %v520_v13 }
  0x54   :  { %491 = vmatpush3.bf16.msra.mxu0 %v526_v31 }
  0x55   :  { %492 = vmatprep.subr.bf16.mxu0 %v645_v0 }
  0x58   :  { %493 = vmatpush3.bf16.msra.mxu0 %v527_v32 }
  0x59   :  { %494 = vmatprep.subr.bf16.mxu0 %v645_v0 }
  0x5c   :  { %495 = vmatpush3.bf16.msra.mxu0 %v528_v33 }
  0xfe   :  { %v147_v20 = vpop.f32.mrf.mxu0 }
  0xff   :  { %v148_v21 = vadd.f32 %v409_v19, %v147_v20 }
 0x100   :  { %v458_v22 = vpop.f32.mrf.mxu0 }
 0x101   :  { %v154_v24 = vmul.f32 0.01, %v148_v21 }
 0x102   :  { %v150_v23 = vpop.f32.mrf.mxu0 }
 0x103   :  { %v151_v25 = vadd.f32 %v409_v19, %v150_v23  ;;  %v156_v28 = vmax.f32 %v148_v21, %v154_v24 }
 0x104   :  { %v459_v26 = vpop.f32.mrf.mxu0 }
 0x105   :  { %v155_v27 = vmul.f32 0.01, %v151_v25 }
 0x107   :  { %v157_v29 = vmax.f32 %v151_v25, %v155_v27 }
 0x109   :  { %v175_v30 = vpack.c.bf16 %v157_v29, %v156_v28 }
 0x10b   :  { %477 = vmatmul.mubr.bf16.vlgmr.msra.gmra.mxu1 %v175_v30 }
 0x1cb   :  { %v264_v35 = vpop.f32.mrf.mxu1 }
 0x1cc   :  { %v265_v36 = vadd.f32 %v413_v34, %v264_v35 }
 0x1cd   :  { %v478_v37 = vpop.f32.mrf.mxu1 }
 0x1ce   :  { %v271_v39 = vmul.f32 0.01, %v265_v36 }
 0x1cf   :  { %v267_v38 = vpop.f32.mrf.mxu1 }
 0x1d0   :  { %v268_v40 = vadd.f32 %v413_v34, %v267_v38  ;;  %v273_v43 = vmax.f32 %v265_v36, %v271_v39 }
 0x1d1   :  { %v479_v41 = vpop.f32.mrf.mxu1 }
 0x1d2   :  { %v272_v42 = vmul.f32 0.01, %v268_v40 }
 0x1d4   :  { %v274_v44 = vmax.f32 %v268_v40, %v272_v42 }
 0x1d6   :  { %v292_v45 = vpack.c.bf16 %v274_v44, %v273_v43 }
 0x1d8   :  { %497 = vmatmul.mubr.bf16.vlgmr.msra.gmra.mxu0 %v292_v45 }
 0x298   :  { %v381_v47 = vpop.f32.mrf.mxu0 }
 0x299   :  { %v382_v48 = vadd.f32 %v422_v46, %v381_v47 }
 0x29a   :  { %v498_v49 = vpop.f32.mrf.mxu0 }
 0x29b   :  { %388 = vst [vmem:[#allocation10] sm:$0xff] %v382_v48 }
 0x29c   :  { %v384_v50 = vpop.f32.mrf.mxu0 }
 0x29d   :  { %v385_v51 = vadd.f32 %v422_v46, %v384_v50 }
 0x29e   :  { %v499_v52 = vpop.f32.mrf.mxu0 }
 0x29f   :  { %389 = vst [vmem:[#allocation10 + $0x8] sm:$0xff] %v385_v51 }
 0x2a0   :  { %620 = shalt.err (!%p617_p10)
}
 0x2a1   :  { %401 = dma.vmem_to_hbm [thread:$0]  %s396_s26, 256, %s758_s7, [#allocation4], %s641_s11, %s641_s11, %s642_s12  }
 0x2a2   :  { %635 = dma.done.wait [#allocation4], 256  }
 0x2a3   :  { %636 = vsyncadd [#allocation4], 4294967040 }
 0x2a4   :  { %405 = vsyncpa [#allocation3], 1 }
 0x2a5   :  { %406 = vsyncpa [#allocation6], 1 }
 0x2a6   :  { %407 = vsyncpa [#allocation9], 1 }
 0x2a7   :  { %408 = vsyncpa [#allocation4], 1 }

</bundles_post_ra>
